<compile_context>
chip_gen: v5e
topology: v5e:2x2
jax: 0.10.0
libtpu: 0.0.40
codegen_flags: <defaults>
</compile_context>

<pallas_src>
import functools

import jax
import jax.numpy as jnp
import numpy as np
from jax.experimental import pallas as pl
from jax.experimental.pallas import tpu as pltpu


def _affine_kernel(obs_ref, w_ref, b_ref, out_ref):
    """out = obs @ W_eff + b_eff  (single MXU pass, f32 accumulation)."""
    w = w_ref[...]
    acc = jnp.dot(obs_ref[...].astype(w.dtype), w,
                  preferred_element_type=jnp.float32)
    out_ref[...] = (acc + b_ref[...].astype(jnp.float32)).astype(out_ref.dtype)


_TILE_CAP = 2048  # rows; per-row footprint is a few hundred bytes


def _pick_tile_b(batch, obs_size, out_width, obs_itemsize,
                 vmem_budget_bytes=8 * 1024 * 1024):
    """Batch-tile rows for the pipelined grid.

    Small/medium batches run as a single full-array block (no padding, no
    forced grid split -- single-TC chips would only pay extra per-step
    overhead).  Large batches use the biggest multiple-of-8 tile up to
    _TILE_CAP that fits a conservative VMEM budget; the resulting multi-step
    "parallel" grid lets v7x shard across its two TensorCores when each tile
    is big enough to amortize the split.
    """
    if batch <= _TILE_CAP:
        return batch
    row_bytes = 2 * (obs_size * obs_itemsize + out_width * 4)  # double-buffered
    tile = min(_TILE_CAP, max(8, vmem_budget_bytes // max(row_bytes, 1)))
    return max(8, (int(tile) // 8) * 8)


def _collapse_params(params, *, deuling, num_actions):
    """Fold hidden Linear stack + Q head (+ dueling V head and correction)
    into a single (W_eff, b_eff).  Exact because the module has no
    nonlinearity and the dueling correction is linear in the head outputs."""
    hdot = functools.partial(jnp.dot, precision=jax.lax.Precision.HIGHEST,
                             preferred_element_type=jnp.float32)
    n_hidden = len(params) - (2 if deuling else 1)

    def row(b):
        return b.reshape(1, -1).astype(jnp.float32)

    wq, bq = params[n_hidden]
    if deuling:
        wv, bv = params[n_hidden + 1]
        w_head = jnp.concatenate([wq, wv], axis=1)               # (hid, A+1)
        b_head = jnp.concatenate([row(bq), row(bv)], axis=1)     # (1, A+1)
    else:
        w_head, b_head = wq, row(bq)

    layers = [(w, row(b)) for (w, b) in params[:n_hidden]] + [(w_head, b_head)]
    w_eff = layers[0][0].astype(jnp.float32)
    b_eff = layers[0][1]
    for w, b in layers[1:]:
        w_eff = hdot(w_eff, w)
        b_eff = hdot(b_eff, w) + b

    if deuling:
        # Q'_j = Q_j + V - mean_k(Q_k)  ==  (Q | V) @ T
        a = num_actions
        t = jnp.eye(a, dtype=jnp.float32) - jnp.full((a, a), 1.0 / a, jnp.float32)
        t = jnp.concatenate([t, jnp.ones((1, a), jnp.float32)], axis=0)  # (A+1, A)
        w_eff = hdot(w_eff, t)
        b_eff = hdot(b_eff, t)
    return w_eff, b_eff


def qnet_forward(obs, params, *, deuling, num_actions, tile_b=None):
    """Fused QNet forward.

    obs:    (B, obs_size) float array
    params: list of (W, b) with W as (in, out) -- transposed vs PyTorch --
            and b as (out,) or (1, out); hidden layers first, then the Q
            head, then (if deuling) the V head.
    Returns (B, num_actions) float32 Q-values.
    """
    B, obs_size = obs.shape
    w_eff, b_eff = _collapse_params(params, deuling=deuling,
                                    num_actions=num_actions)
    out_w = num_actions

    if tile_b is None:
        tile_b = _pick_tile_b(B, obs_size, out_w, obs.dtype.itemsize)
    tile_b = int(tile_b)

    grid = (pl.cdiv(B, tile_b),)

    flops = 2 * B * obs_size * out_w
    bytes_accessed = (obs.size * obs.dtype.itemsize
                      + w_eff.size * 4 + b_eff.size * 4 + B * out_w * 4)

    return pl.pallas_call(
        _affine_kernel,
        out_shape=jax.ShapeDtypeStruct((B, out_w), jnp.float32),
        grid_spec=pltpu.PrefetchScalarGridSpec(
            num_scalar_prefetch=0,
            grid=grid,
            in_specs=[
                pl.BlockSpec((tile_b, obs_size), lambda i: (i, 0)),
                # Grid-invariant weight/bias blocks: not re-fetched per tile.
                pl.BlockSpec((obs_size, out_w), lambda i: (0, 0)),
                pl.BlockSpec((1, out_w), lambda i: (0, 0)),
            ],
            out_specs=pl.BlockSpec((tile_b, out_w), lambda i: (i, 0)),
        ),
        compiler_params=pltpu.CompilerParams(
            dimension_semantics=("parallel",),
        ),
        cost_estimate=pl.CostEstimate(
            flops=int(flops), transcendentals=0,
            bytes_accessed=int(bytes_accessed)),
    )(obs, w_eff, b_eff)


def init_qnet_params(key, obs_size, num_actions, hidden_sizes, deuling):
    """Deterministic init mirroring nn.Linear's default U(-1/sqrt(fan_in), +).

    The dueling V head takes the *hidden* output (fan_in = last hidden size),
    exactly like the PyTorch module.
    """
    def linear(k, fan_in, fan_out):
        kw, kb = jax.random.split(k)
        bound = 1.0 / float(np.sqrt(fan_in))
        w = jax.random.uniform(kw, (fan_in, fan_out), jnp.float32, -bound, bound)
        b = jax.random.uniform(kb, (1, fan_out), jnp.float32, -bound, bound)
        return w, b

    params = []
    last = obs_size
    for size in hidden_sizes:
        key, k = jax.random.split(key)
        params.append(linear(k, last, size))
        last = size
    key, kq = jax.random.split(key)
    params.append(linear(kq, last, num_actions))
    if deuling:
        key, kv = jax.random.split(key)
        params.append(linear(kv, last, 1))
    return params


def qnet_reference(obs, params, *, deuling):
    """Pure-JAX layer-by-layer reference matching the PyTorch module."""
    dot = functools.partial(jnp.dot, precision=jax.lax.Precision.HIGHEST,
                            preferred_element_type=jnp.float32)
    n_hidden = len(params) - (2 if deuling else 1)
    h = obs
    for w, b in params[:n_hidden]:
        h = dot(h, w) + b.reshape(1, -1)
    wq, bq = params[n_hidden]
    q = dot(h, wq) + bq.reshape(1, -1)
    if deuling:
        wv, bv = params[n_hidden + 1]
        v = dot(h, wv) + bv.reshape(1, -1)
        q = q + (v - jnp.mean(q, axis=1, keepdims=True))
    return q


if __name__ == "__main__":
    batch = 256
    obs_size = 32
    hidden_sizes = (64, 32)
    num_actions = 8
    deuling = True

    key = jax.random.PRNGKey(0)
    key, kobs = jax.random.split(key)
    obs = jax.random.normal(kobs, (batch, obs_size), jnp.float32)
    params = init_qnet_params(key, obs_size, num_actions, hidden_sizes, deuling)

    # Dueling path, single full-array block.
    q = qnet_forward(obs, params, deuling=deuling, num_actions=num_actions)
    q = jax.block_until_ready(q)
    q_ref = qnet_reference(obs, params, deuling=deuling)
    assert q.shape == (batch, num_actions), q.shape
    assert jnp.allclose(q, q_ref, atol=5e-3, rtol=5e-3), (
        "dueling mismatch: max abs err "
        f"{float(jnp.max(jnp.abs(q - q_ref)))}")

    # Multi-step grid with a write-masked partial last block (256 = 2*96 + 64).
    q_tiled = qnet_forward(obs, params, deuling=deuling,
                           num_actions=num_actions, tile_b=96)
    q_tiled = jax.block_until_ready(q_tiled)
    assert jnp.allclose(q_tiled, q_ref, atol=5e-3, rtol=5e-3), "tiled mismatch"

    # Non-dueling path + ragged (non multiple-of-8) batch as one full block.
    params_nd = init_qnet_params(jax.random.PRNGKey(1), obs_size, num_actions,
                                 hidden_sizes, False)
    obs_ragged = obs[:37]
    q2 = qnet_forward(obs_ragged, params_nd, deuling=False,
                      num_actions=num_actions)
    q2 = jax.block_until_ready(q2)
    q2_ref = qnet_reference(obs_ragged, params_nd, deuling=False)
    assert q2.shape == (37, num_actions), q2.shape
    assert jnp.allclose(q2, q2_ref, atol=5e-3, rtol=5e-3), "non-dueling mismatch"

    print("KERNEL_OK")
</pallas_src>

<mosaic_0001>
module attributes {stable_mosaic.version = 11 : i64} {
  func.func @_affine_kernel(%arg0: i32, %arg1: memref<256x32xf32, #tpu.memory_space<vmem>>, %arg2: memref<32x8xf32, #tpu.memory_space<vmem>>, %arg3: memref<1x8xf32, #tpu.memory_space<vmem>>, %arg4: memref<256x8xf32, #tpu.memory_space<vmem>>) attributes {dimension_semantics = [#tpu.dimension_semantics<parallel>], iteration_bounds = array<i64: 1>, scalar_prefetch = 0 : i64, scratch_operands = 0 : i64, tpu.core_type = #tpu.core_type<tc>, window_params = [{transform_indices = @transform_0, window_bounds = array<i64: 256, 32>}, {pipeline_mode = #tpu.pipeline_mode<synchronous>, transform_indices = @transform_1, window_bounds = array<i64: 32, 8>}, {pipeline_mode = #tpu.pipeline_mode<synchronous>, transform_indices = @transform_2, window_bounds = array<i64: 1, 8>}, {transform_indices = @transform_3, window_bounds = array<i64: 256, 8>}]} {
    %c0 = arith.constant 0 : index
    %c0_0 = arith.constant 0 : index
    %0 = vector.load %arg2[%c0, %c0_0] : memref<32x8xf32, #tpu.memory_space<vmem>>, vector<32x8xf32>
    %c0_1 = arith.constant 0 : index
    %c0_2 = arith.constant 0 : index
    %1 = vector.load %arg1[%c0_1, %c0_2] : memref<256x32xf32, #tpu.memory_space<vmem>>, vector<256x32xf32>
    %cst = arith.constant dense<0.000000e+00> : vector<256x8xf32>
    %2 = tpu.matmul %1, %0, %cst {dimension_numbers = #tpu.dot_dimension_numbers<[1], [0], [0], [1], [0, 0, 1, 1], [], []>} : vector<256x32xf32>, vector<32x8xf32>, vector<256x8xf32> -> vector<256x8xf32>
    %c0_3 = arith.constant 0 : index
    %c0_4 = arith.constant 0 : index
    %3 = vector.load %arg3[%c0_3, %c0_4] : memref<1x8xf32, #tpu.memory_space<vmem>>, vector<1x8xf32>
    %4 = vector.broadcast %3 : vector<1x8xf32> to vector<256x8xf32>
    %5 = arith.addf %2, %4 : vector<256x8xf32>
    %c0_5 = arith.constant 0 : index
    %c0_6 = arith.constant 0 : index
    %6 = vector.load %arg4[%c0_5, %c0_6] : memref<256x8xf32, #tpu.memory_space<vmem>>, vector<256x8xf32>
    tpu.vector_store %arg4[%c0_5, %c0_6], %5 {strides = array<i32>} : memref<256x8xf32, #tpu.memory_space<vmem>>, vector<256x8xf32>,
    return
  }
  func.func @transform_0(%arg0: i32) -> (i32, i32) {
    %c0_i32 = arith.constant 0 : i32
    %c0_i32_0 = arith.constant 0 : i32
    return %arg0, %c0_i32 : i32, i32
  }
  func.func @transform_1(%arg0: i32) -> (i32, i32) {
    %c0_i32 = arith.constant 0 : i32
    %c0_i32_0 = arith.constant 0 : i32
    %c0_i32_1 = arith.constant 0 : i32
    return %c0_i32, %c0_i32_0 : i32, i32
  }
  func.func @transform_2(%arg0: i32) -> (i32, i32) {
    %c0_i32 = arith.constant 0 : i32
    %c0_i32_0 = arith.constant 0 : i32
    %c0_i32_1 = arith.constant 0 : i32
    return %c0_i32, %c0_i32_0 : i32, i32
  }
  func.func @transform_3(%arg0: i32) -> (i32, i32) {
    %c0_i32 = arith.constant 0 : i32
    %c0_i32_0 = arith.constant 0 : i32
    return %arg0, %c0_i32 : i32, i32
  }
}

</mosaic_0001>

<bundles_post_ra>
// kernel: tpu_custom_call.1
= control target key start
LH: loop header
LB: loop body
LE: loop exit
PB: predicated region body
PF: predicated region fallthrough
CT: control target
= control target key end

     0   :  { %vm54_vm0 = vcmask 261120   ;;  %vm264_vm1 = vcmask 64512   ;;  %s671_s1 = inlined_call_operand.vmem [shape: f32[32,8], index: 1, kind: input, shape index: {}]   ;;  %s672_s0 = inlined_call_operand.vmem [shape: f32[256,32], index: 0, kind: input, shape index: {}]   ;;  %s673_s2 = inlined_call_operand.vmem [shape: f32[1,8], index: 2, kind: input, shape index: {}]   ;;  %s674_s3 = inlined_call_operand.vmem [shape: f32[256,8], index: 3, kind: output, shape index: {}]  }
   0x1   :  { %v17_v0 = vld [vmem:[%s671_s1 + $0x18] sm:$0xff]  ;;  %v16_v1 = vld [vmem:[%s671_s1 + $0x10] sm:$0xff]  ;;  %v15_v2 = vld [vmem:[%s671_s1 + $0x8] sm:$0xff] }
   0x2   :  { %334 = vmatpush.msra.mxu2 %v17_v0  ;;  %335 = vmatpush.msra.mxu3 %v17_v0  ;;  %v14_v3 = vld [vmem:[%s671_s1] sm:$0xff]  ;;  %v35_v8 = vld [vmem:[%s672_s0 + $0x88] sm:$0xff]  ;;  %v36_v12 = vld [vmem:[%s672_s0 + $0x90] sm:$0xff] }
   0x3   :  { %163 = vmatpush.msra.mxu0 %v17_v0  ;;  %333 = vmatpush.msra.mxu1 %v17_v0  ;;  %v34_v4 = vld [vmem:[%s672_s0 + $0x80] sm:$0xff]  ;;  %v43_v9 = vld [vmem:[%s672_s0 + $0xc8] sm:$0xff]  ;;  %v44_v13 = vld [vmem:[%s672_s0 + $0xd0] sm:$0xff] }
   0x4   :  { %337 = vmatpush.msra.mxu2 %v16_v1  ;;  %338 = vmatpush.msra.mxu3 %v16_v1  ;;  %v42_v5 = vld [vmem:[%s672_s0 + $0xc0] sm:$0xff]  ;;  %v19_v10 = vld [vmem:[%s672_s0 + $0x8] sm:$0xff]  ;;  %v20_v14 = vld [vmem:[%s672_s0 + $0x10] sm:$0xff] }
   0x5   :  { %164 = vmatpush.msra.mxu0 %v16_v1  ;;  %336 = vmatpush.msra.mxu1 %v16_v1  ;;  %v18_v6 = vld [vmem:[%s672_s0] sm:$0xff]  ;;  %v27_v11 = vld [vmem:[%s672_s0 + $0x48] sm:$0xff]  ;;  %v28_v15 = vld [vmem:[%s672_s0 + $0x50] sm:$0xff] }
   0x6   :  { %340 = vmatpush.msra.mxu2 %v15_v2  ;;  %341 = vmatpush.msra.mxu3 %v15_v2  ;;  %v26_v7 = vld [vmem:[%s672_s0 + $0x40] sm:$0xff]  ;;  %v37_v16 = vld [vmem:[%s672_s0 + $0x98] sm:$0xff]  ;;  %v39_v24 = vld [vmem:[%s672_s0 + $0xa8] sm:$0xff] }
   0x7   :  { %165 = vmatpush.msra.mxu0 %v15_v2  ;;  %339 = vmatpush.msra.mxu1 %v15_v2  ;;  %v45_v17 = vld [vmem:[%s672_s0 + $0xd8] sm:$0xff]  ;;  %v38_v20 = vld [vmem:[%s672_s0 + $0xa0] sm:$0xff]  ;;  %v47_v25 = vld [vmem:[%s672_s0 + $0xe8] sm:$0xff] }
   0x8   :  { %343 = vmatpush.msra.mxu2 %v14_v3  ;;  %344 = vmatpush.msra.mxu3 %v14_v3  ;;  %v21_v18 = vld [vmem:[%s672_s0 + $0x18] sm:$0xff]  ;;  %v46_v21 = vld [vmem:[%s672_s0 + $0xe0] sm:$0xff]  ;;  %v23_v26 = vld [vmem:[%s672_s0 + $0x28] sm:$0xff] }
   0x9   :  { %317 = vmatmul.msk.f32.vlgmr.msra.gmra.mxu2 %vm54_vm0, %v34_v4  ;;  %325 = vmatmul.msk.f32.vlgmr.msra.gmra.mxu3 %vm54_vm0, %v42_v5  ;;  %v29_v19 = vld [vmem:[%s672_s0 + $0x58] sm:$0xff]  ;;  %v22_v22 = vld [vmem:[%s672_s0 + $0x20] sm:$0xff]  ;;  %v31_v27 = vld [vmem:[%s672_s0 + $0x68] sm:$0xff] }
   0xa   :  { %166 = vmatpush.msra.mxu0 %v14_v3  ;;  %342 = vmatpush.msra.mxu1 %v14_v3  ;;  %v30_v23 = vld [vmem:[%s672_s0 + $0x60] sm:$0xff]  ;;  %v40_v28 = vld [vmem:[%s672_s0 + $0xb0] sm:$0xff]  ;;  %v41_v32 = vld [vmem:[%s672_s0 + $0xb8] sm:$0xff] }
   0xb   :  { %301 = vmatmul.msk.f32.vlgmr.msra.gmra.mxu0 %vm54_vm0, %v18_v6  ;;  %309 = vmatmul.msk.f32.vlgmr.msra.gmra.mxu1 %vm54_vm0, %v26_v7  ;;  %v48_v29 = vld [vmem:[%s672_s0 + $0xf0] sm:$0xff]  ;;  %v49_v33 = vld [vmem:[%s672_s0 + $0xf8] sm:$0xff]  ;;  %v509_v36 = vld [vmem:[%s673_s2] ss:$0 sm:$0xff] }
   0xc   :  { %v24_v30 = vld [vmem:[%s672_s0 + $0x30] sm:$0xff]  ;;  %v25_v34 = vld [vmem:[%s672_s0 + $0x38] sm:$0xff] }
   0xd   :  { %v32_v31 = vld [vmem:[%s672_s0 + $0x70] sm:$0xff]  ;;  %v33_v35 = vld [vmem:[%s672_s0 + $0x78] sm:$0xff] }
  0x11   :  { %318 = vmatmul.msk.f32.gmra.mxu2 %vm54_vm0, %v35_v8  ;;  %326 = vmatmul.msk.f32.gmra.mxu3 %vm54_vm0, %v43_v9 }
  0x13   :  { %302 = vmatmul.msk.f32.gmra.mxu0 %vm54_vm0, %v19_v10  ;;  %310 = vmatmul.msk.f32.gmra.mxu1 %vm54_vm0, %v27_v11 }
  0x19   :  { %319 = vmatmul.msk.f32.gmra.mxu2 %vm54_vm0, %v36_v12  ;;  %327 = vmatmul.msk.f32.gmra.mxu3 %vm54_vm0, %v44_v13 }
  0x1b   :  { %303 = vmatmul.msk.f32.gmra.mxu0 %vm54_vm0, %v20_v14  ;;  %311 = vmatmul.msk.f32.gmra.mxu1 %vm54_vm0, %v28_v15 }
  0x21   :  { %320 = vmatmul.msk.f32.gmra.mxu2 %vm54_vm0, %v37_v16  ;;  %328 = vmatmul.msk.f32.gmra.mxu3 %vm54_vm0, %v45_v17 }
  0x23   :  { %304 = vmatmul.msk.f32.gmra.mxu0 %vm54_vm0, %v21_v18  ;;  %312 = vmatmul.msk.f32.gmra.mxu1 %vm54_vm0, %v29_v19 }
  0x29   :  { %321 = vmatmul.msk.f32.gmra.mxu2 %vm54_vm0, %v38_v20  ;;  %329 = vmatmul.msk.f32.gmra.mxu3 %vm54_vm0, %v46_v21 }
  0x2b   :  { %305 = vmatmul.msk.f32.gmra.mxu0 %vm54_vm0, %v22_v22  ;;  %313 = vmatmul.msk.f32.gmra.mxu1 %vm54_vm0, %v30_v23 }
  0x31   :  { %322 = vmatmul.msk.f32.gmra.mxu2 %vm54_vm0, %v39_v24  ;;  %330 = vmatmul.msk.f32.gmra.mxu3 %vm54_vm0, %v47_v25 }
  0x33   :  { %306 = vmatmul.msk.f32.gmra.mxu0 %vm54_vm0, %v23_v26  ;;  %314 = vmatmul.msk.f32.gmra.mxu1 %vm54_vm0, %v31_v27 }
  0x39   :  { %323 = vmatmul.msk.f32.gmra.mxu2 %vm54_vm0, %v40_v28  ;;  %331 = vmatmul.msk.f32.gmra.mxu3 %vm54_vm0, %v48_v29 }
  0x3b   :  { %307 = vmatmul.msk.f32.gmra.mxu0 %vm54_vm0, %v24_v30  ;;  %315 = vmatmul.msk.f32.gmra.mxu1 %vm54_vm0, %v32_v31 }
  0x41   :  { %324 = vmatmul.msk.f32.gmra.mxu2 %vm54_vm0, %v41_v32  ;;  %332 = vmatmul.msk.f32.gmra.mxu3 %vm54_vm0, %v49_v33 }
  0x43   :  { %308 = vmatmul.msk.f32.gmra.mxu0 %vm54_vm0, %v25_v34  ;;  %316 = vmatmul.msk.f32.gmra.mxu1 %vm54_vm0, %v33_v35 }
  0x88   :  { %v168_v37 = vpop.f32.mrf.mxu0  ;;  %v192_v38 = vpop.f32.mrf.mxu1 }
  0x89   :  { %v169_v39 = vadd.f32 %v509_v36, %v168_v37  ;;  %v193_v40 = vadd.f32 %v509_v36, %v192_v38 }
  0x8b   :  { %265 = vst.msk [vmem:[%s674_s3] sm:$0xff] %vm264_vm1, %v169_v39 }
  0x8c   :  { %273 = vst.msk [vmem:[%s674_s3 + $0x40] sm:$0xff] %vm264_vm1, %v193_v40  ;;  %v216_v41 = vpop.f32.mrf.mxu2  ;;  %v240_v42 = vpop.f32.mrf.mxu3 }
  0x8d   :  { %v217_v43 = vadd.f32 %v509_v36, %v216_v41  ;;  %v241_v44 = vadd.f32 %v509_v36, %v240_v42 }
  0x8f   :  { %281 = vst.msk [vmem:[%s674_s3 + $0x80] sm:$0xff] %vm264_vm1, %v217_v43 }
  0x90   :  { %289 = vst.msk [vmem:[%s674_s3 + $0xc0] sm:$0xff] %vm264_vm1, %v241_v44  ;;  %v171_v45 = vpop.f32.mrf.mxu0  ;;  %v195_v46 = vpop.f32.mrf.mxu1 }
  0x91   :  { %v172_v47 = vadd.f32 %v509_v36, %v171_v45  ;;  %v196_v48 = vadd.f32 %v509_v36, %v195_v46 }
  0x93   :  { %266 = vst.msk [vmem:[%s674_s3 + $0x8] sm:$0xff] %vm264_vm1, %v172_v47 }
  0x94   :  { %274 = vst.msk [vmem:[%s674_s3 + $0x48] sm:$0xff] %vm264_vm1, %v196_v48  ;;  %v219_v49 = vpop.f32.mrf.mxu2  ;;  %v243_v50 = vpop.f32.mrf.mxu3 }
  0x95   :  { %v220_v51 = vadd.f32 %v509_v36, %v219_v49  ;;  %v244_v52 = vadd.f32 %v509_v36, %v243_v50 }
  0x97   :  { %282 = vst.msk [vmem:[%s674_s3 + $0x88] sm:$0xff] %vm264_vm1, %v220_v51 }
  0x98   :  { %290 = vst.msk [vmem:[%s674_s3 + $0xc8] sm:$0xff] %vm264_vm1, %v244_v52  ;;  %v174_v53 = vpop.f32.mrf.mxu0  ;;  %v198_v54 = vpop.f32.mrf.mxu1 }
  0x99   :  { %v175_v55 = vadd.f32 %v509_v36, %v174_v53  ;;  %v199_v56 = vadd.f32 %v509_v36, %v198_v54 }
  0x9b   :  { %267 = vst.msk [vmem:[%s674_s3 + $0x10] sm:$0xff] %vm264_vm1, %v175_v55 }
  0x9c   :  { %275 = vst.msk [vmem:[%s674_s3 + $0x50] sm:$0xff] %vm264_vm1, %v199_v56  ;;  %v222_v57 = vpop.f32.mrf.mxu2  ;;  %v246_v58 = vpop.f32.mrf.mxu3 }
  0x9d   :  { %v223_v59 = vadd.f32 %v509_v36, %v222_v57  ;;  %v247_v60 = vadd.f32 %v509_v36, %v246_v58 }
  0x9f   :  { %283 = vst.msk [vmem:[%s674_s3 + $0x90] sm:$0xff] %vm264_vm1, %v223_v59 }
  0xa0   :  { %291 = vst.msk [vmem:[%s674_s3 + $0xd0] sm:$0xff] %vm264_vm1, %v247_v60  ;;  %v177_v61 = vpop.f32.mrf.mxu0  ;;  %v201_v62 = vpop.f32.mrf.mxu1 }
  0xa1   :  { %v178_v63 = vadd.f32 %v509_v36, %v177_v61  ;;  %v202_v0 = vadd.f32 %v509_v36, %v201_v62 }
  0xa3   :  { %268 = vst.msk [vmem:[%s674_s3 + $0x18] sm:$0xff] %vm264_vm1, %v178_v63 }
  0xa4   :  { %276 = vst.msk [vmem:[%s674_s3 + $0x58] sm:$0xff] %vm264_vm1, %v202_v0  ;;  %v225_v1 = vpop.f32.mrf.mxu2  ;;  %v249_v2 = vpop.f32.mrf.mxu3 }
  0xa5   :  { %v226_v3 = vadd.f32 %v509_v36, %v225_v1  ;;  %v250_v4 = vadd.f32 %v509_v36, %v249_v2 }
  0xa7   :  { %284 = vst.msk [vmem:[%s674_s3 + $0x98] sm:$0xff] %vm264_vm1, %v226_v3 }
  0xa8   :  { %292 = vst.msk [vmem:[%s674_s3 + $0xd8] sm:$0xff] %vm264_vm1, %v250_v4  ;;  %v180_v5 = vpop.f32.mrf.mxu0  ;;  %v204_v6 = vpop.f32.mrf.mxu1 }
  0xa9   :  { %v181_v7 = vadd.f32 %v509_v36, %v180_v5  ;;  %v205_v8 = vadd.f32 %v509_v36, %v204_v6 }
  0xab   :  { %269 = vst.msk [vmem:[%s674_s3 + $0x20] sm:$0xff] %vm264_vm1, %v181_v7 }
  0xac   :  { %277 = vst.msk [vmem:[%s674_s3 + $0x60] sm:$0xff] %vm264_vm1, %v205_v8  ;;  %v228_v9 = vpop.f32.mrf.mxu2  ;;  %v252_v10 = vpop.f32.mrf.mxu3 }
  0xad   :  { %v229_v11 = vadd.f32 %v509_v36, %v228_v9  ;;  %v253_v12 = vadd.f32 %v509_v36, %v252_v10 }
  0xaf   :  { %285 = vst.msk [vmem:[%s674_s3 + $0xa0] sm:$0xff] %vm264_vm1, %v229_v11 }
  0xb0   :  { %293 = vst.msk [vmem:[%s674_s3 + $0xe0] sm:$0xff] %vm264_vm1, %v253_v12  ;;  %v183_v13 = vpop.f32.mrf.mxu0  ;;  %v207_v14 = vpop.f32.mrf.mxu1 }
  0xb1   :  { %v184_v15 = vadd.f32 %v509_v36, %v183_v13  ;;  %v208_v16 = vadd.f32 %v509_v36, %v207_v14 }
  0xb3   :  { %270 = vst.msk [vmem:[%s674_s3 + $0x28] sm:$0xff] %vm264_vm1, %v184_v15 }
  0xb4   :  { %278 = vst.msk [vmem:[%s674_s3 + $0x68] sm:$0xff] %vm264_vm1, %v208_v16  ;;  %v231_v17 = vpop.f32.mrf.mxu2  ;;  %v255_v18 = vpop.f32.mrf.mxu3 }
  0xb5   :  { %v232_v19 = vadd.f32 %v509_v36, %v231_v17  ;;  %v256_v20 = vadd.f32 %v509_v36, %v255_v18 }
  0xb7   :  { %286 = vst.msk [vmem:[%s674_s3 + $0xa8] sm:$0xff] %vm264_vm1, %v232_v19 }
  0xb8   :  { %294 = vst.msk [vmem:[%s674_s3 + $0xe8] sm:$0xff] %vm264_vm1, %v256_v20  ;;  %v186_v21 = vpop.f32.mrf.mxu0  ;;  %v210_v22 = vpop.f32.mrf.mxu1 }
  0xb9   :  { %v187_v23 = vadd.f32 %v509_v36, %v186_v21  ;;  %v211_v24 = vadd.f32 %v509_v36, %v210_v22 }
  0xbb   :  { %271 = vst.msk [vmem:[%s674_s3 + $0x30] sm:$0xff] %vm264_vm1, %v187_v23 }
  0xbc   :  { %279 = vst.msk [vmem:[%s674_s3 + $0x70] sm:$0xff] %vm264_vm1, %v211_v24  ;;  %v234_v25 = vpop.f32.mrf.mxu2  ;;  %v258_v26 = vpop.f32.mrf.mxu3 }
  0xbd   :  { %v235_v27 = vadd.f32 %v509_v36, %v234_v25  ;;  %v259_v28 = vadd.f32 %v509_v36, %v258_v26 }
  0xbf   :  { %287 = vst.msk [vmem:[%s674_s3 + $0xb0] sm:$0xff] %vm264_vm1, %v235_v27 }
  0xc0   :  { %295 = vst.msk [vmem:[%s674_s3 + $0xf0] sm:$0xff] %vm264_vm1, %v259_v28  ;;  %v189_v29 = vpop.f32.mrf.mxu0  ;;  %v213_v30 = vpop.f32.mrf.mxu1 }
  0xc1   :  { %v190_v31 = vadd.f32 %v509_v36, %v189_v29  ;;  %v214_v32 = vadd.f32 %v509_v36, %v213_v30 }
  0xc3   :  { %272 = vst.msk [vmem:[%s674_s3 + $0x38] sm:$0xff] %vm264_vm1, %v190_v31 }
  0xc4   :  { %280 = vst.msk [vmem:[%s674_s3 + $0x78] sm:$0xff] %vm264_vm1, %v214_v32  ;;  %v237_v33 = vpop.f32.mrf.mxu2  ;;  %v261_v34 = vpop.f32.mrf.mxu3 }
  0xc5   :  { %v238_v35 = vadd.f32 %v509_v36, %v237_v33  ;;  %v262_v37 = vadd.f32 %v509_v36, %v261_v34 }
  0xc7   :  { %288 = vst.msk [vmem:[%s674_s3 + $0xb8] sm:$0xff] %vm264_vm1, %v238_v35 }
  0xc8   :  { %296 = vst.msk [vmem:[%s674_s3 + $0xf8] sm:$0xff] %vm264_vm1, %v262_v37 }

</bundles_post_ra>
